<compile_context>
chip_gen: v6e
topology: v6e:2x2x1
jax: 0.10.0
libtpu: 0.0.40
codegen_flags: <defaults>
</compile_context>

<pallas_src>
import functools

import jax
import jax.numpy as jnp
import numpy as np
from jax.experimental import pallas as pl
from jax.experimental.pallas import tpu as pltpu


def _sepconv_kernel(x_ref, wdw_ref, wpw_ref, bias_ref, o_ref, *, K, dilation, Wp):
    # x_ref:    (1, Cin, Hp*Wp + span)  padded input, spatially flattened (lane-dense)
    # wdw_ref:  (K*K, Cin, 1)           depthwise weights, tap-major
    # wpw_ref:  (Cout, Cin)             pointwise weights with BN scale folded in
    # wbias:    (Cout, 1)               BN shift folded through the pointwise conv
    # o_ref:    (1, Cout, H*Wp)         "wide" output (pad columns cropped by wrapper)
    L = o_ref.shape[2]                  # H * Wp
    x = x_ref[0]                        # (Cin, Hp*Wp + span)

    # Depthwise (dilated) KxK conv: K*K lane-shifted multiply-accumulates.
    # Spatial sits on the lane axis -> dense VPU work; shifts are cheap lane
    # offsets (XLU).  Per-tap weight is (Cin, 1), broadcast along lanes only.
    acc = x[:, 0:L] * wdw_ref[0]
    for t in range(1, K * K):
        kh, kw = divmod(t, K)
        off = kh * dilation * Wp + kw * dilation
        acc = acc + x[:, off:off + L] * wdw_ref[t]

    # Pointwise 1x1 conv (BN scale pre-folded): single MXU matmul with the
    # spatial extent on the minor/N dimension, then folded-BN bias add.
    out = jnp.dot(wpw_ref[...], acc, preferred_element_type=jnp.float32)
    o_ref[0] = out + bias_ref[...]


def separable_conv2d(x_nchw, w_dw, bn_gamma, bn_beta, bn_mean, bn_var, w_pw,
                     *, kernel_size=3, stride=1, dilation=1, eps=1e-5):
    """x_nchw: (N, Cin, H, W). Returns (N, Cout, H, W) matching PyTorch."""
    assert stride == 1, "SeparableConv2d Pallas kernel supports stride=1 only"
    N, Cin, H, W = x_nchw.shape
    Cout = w_pw.shape[0]
    K = kernel_size

    # fixed_padding from the reference module.
    k_eff = K + (K - 1) * (dilation - 1)
    pad_total = k_eff - 1                # == (K - 1) * dilation
    pad_beg = pad_total // 2
    pad_end = pad_total - pad_beg
    span = pad_total
    Hp, Wp = H + pad_total, W + pad_total

    # Pad spatially (NCHW is already channel-major -> no transpose needed),
    # flatten H,W (contiguous, free) and append `span` zeros so every
    # lane-shifted depthwise tap stays in bounds.
    xp = jnp.pad(x_nchw.astype(jnp.float32),
                 ((0, 0), (0, 0), (pad_beg, pad_end), (pad_beg, pad_end)))
    xf = jnp.pad(xp.reshape(N, Cin, Hp * Wp), ((0, 0), (0, 0), (0, span)))
    Lp = Hp * Wp + span
    L = H * Wp                           # wide output length per image

    # Depthwise weights: (Cin, 1, K, K) -> tap-major (K*K, Cin, 1).
    wdw = jnp.transpose(w_dw[:, 0].reshape(Cin, K * K), (1, 0))
    wdw = wdw.reshape(K * K, Cin, 1).astype(jnp.float32)

    # Fold the (inference-mode) BatchNorm affine into the pointwise conv:
    #   out = Wpw @ (scale*dw + shift) = (Wpw*scale) @ dw + Wpw @ shift
    scale = (bn_gamma / jnp.sqrt(bn_var + eps)).astype(jnp.float32)      # (Cin,)
    shift = (bn_beta - bn_mean * scale).astype(jnp.float32)              # (Cin,)
    wpw2d = w_pw[:, :, 0, 0].astype(jnp.float32)                         # (Cout, Cin)
    wpw_f = wpw2d * scale[None, :]                                       # (Cout, Cin)
    bias = (wpw2d @ shift).reshape(Cout, 1)                              # (Cout, 1)

    kernel = functools.partial(_sepconv_kernel, K=K, dilation=dilation, Wp=Wp)

    out_wide = pl.pallas_call(
        kernel,
        out_shape=jax.ShapeDtypeStruct((N, Cout, L), jnp.float32),
        grid_spec=pltpu.PrefetchScalarGridSpec(
            num_scalar_prefetch=0,
            grid=(N,),
            in_specs=[
                pl.BlockSpec((1, Cin, Lp), lambda n: (n, 0, 0)),
                pl.BlockSpec((K * K, Cin, 1), lambda n: (0, 0, 0)),
                pl.BlockSpec((Cout, Cin), lambda n: (0, 0)),
                pl.BlockSpec((Cout, 1), lambda n: (0, 0)),
            ],
            out_specs=pl.BlockSpec((1, Cout, L), lambda n: (n, 0, 0)),
        ),
        compiler_params=pltpu.CompilerParams(
            dimension_semantics=("parallel",),
            vmem_limit_bytes=32 * 1024 * 1024),
    )(xf, wdw, wpw_f, bias)

    # Drop the Wp-W pad columns of each row; reshape is free (contiguous),
    # the crop is tiny XLA glue.  Output is already NCHW -> no transpose.
    return out_wide.reshape(N, Cout, H, Wp)[..., :W]


def _reference(x_nchw, w_dw, bn_gamma, bn_beta, bn_mean, bn_var, w_pw,
               *, kernel_size=3, dilation=1, eps=1e-5):
    """Pure-JAX reference using lax convolutions (mirrors the PyTorch forward)."""
    N, Cin, H, W = x_nchw.shape
    K = kernel_size
    k_eff = K + (K - 1) * (dilation - 1)
    pad_total = k_eff - 1
    pad_beg = pad_total // 2
    pad_end = pad_total - pad_beg

    xp = jnp.pad(x_nchw, ((0, 0), (0, 0), (pad_beg, pad_end), (pad_beg, pad_end)))
    dn = ("NCHW", "OIHW", "NCHW")
    y = jax.lax.conv_general_dilated(
        xp, w_dw, window_strides=(1, 1), padding=[(0, 0), (0, 0)],
        rhs_dilation=(dilation, dilation), feature_group_count=Cin,
        dimension_numbers=dn)
    scale = bn_gamma / jnp.sqrt(bn_var + eps)
    shift = bn_beta - bn_mean * scale
    y = y * scale[None, :, None, None] + shift[None, :, None, None]
    y = jax.lax.conv_general_dilated(
        y, w_pw, window_strides=(1, 1), padding=[(0, 0), (0, 0)],
        dimension_numbers=dn)
    return y


if __name__ == "__main__":
    # SeparableConv2d(inplanes=4, planes=8, kernel_size=3, stride=1, dilation=1)
    N, Cin, H, W = 2, 4, 16, 16
    Cout = 8
    K = 3

    key = jax.random.PRNGKey(0)
    kx, kdw, kpw, kg, kb, km, kv = jax.random.split(key, 7)

    x = jax.random.normal(kx, (N, Cin, H, W), dtype=jnp.float32)
    # conv1 (depthwise): weight shape (inplanes, 1, K, K), bias=False
    w_dw = jax.random.normal(kdw, (Cin, 1, K, K), dtype=jnp.float32) * 0.1
    # pointwise: weight shape (planes, inplanes, 1, 1), bias=False
    w_pw = jax.random.normal(kpw, (Cout, Cin, 1, 1), dtype=jnp.float32) * 0.1
    # BatchNorm(inplanes) parameters (inference-mode)
    bn_gamma = 1.0 + 0.1 * jax.random.normal(kg, (Cin,), dtype=jnp.float32)
    bn_beta = 0.1 * jax.random.normal(kb, (Cin,), dtype=jnp.float32)
    bn_mean = 0.1 * jax.random.normal(km, (Cin,), dtype=jnp.float32)
    bn_var = jnp.abs(jax.random.normal(kv, (Cin,), dtype=jnp.float32)) + 0.5

    out = separable_conv2d(x, w_dw, bn_gamma, bn_beta, bn_mean, bn_var, w_pw,
                           kernel_size=K, stride=1, dilation=1)
    out = jax.block_until_ready(out)

    ref = _reference(x, w_dw, bn_gamma, bn_beta, bn_mean, bn_var, w_pw,
                     kernel_size=K, dilation=1)
    ref = jax.block_until_ready(ref)

    assert out.shape == (N, Cout, H, W), out.shape
    np.testing.assert_allclose(np.asarray(out), np.asarray(ref),
                               rtol=1e-4, atol=1e-4)
    print("KERNEL_OK")
</pallas_src>

<mosaic_0001>
module attributes {stable_mosaic.version = 11 : i64} {
  func.func @_sepconv_kernel(%arg0: i32, %arg1: memref<1x4x326xf32, #tpu.memory_space<vmem>>, %arg2: memref<9x4x1xf32, #tpu.memory_space<vmem>>, %arg3: memref<8x4xf32, #tpu.memory_space<vmem>>, %arg4: memref<8x1xf32, #tpu.memory_space<vmem>>, %arg5: memref<1x8x288xf32, #tpu.memory_space<vmem>>) attributes {dimension_semantics = [#tpu.dimension_semantics<parallel>], iteration_bounds = array<i64: 2>, scalar_prefetch = 0 : i64, scratch_operands = 0 : i64, tpu.core_type = #tpu.core_type<tc>, window_params = [{transform_indices = @transform_0, window_bounds = array<i64: 1, 4, 326>}, {pipeline_mode = #tpu.pipeline_mode<synchronous>, transform_indices = @transform_1, window_bounds = array<i64: 9, 4, 1>}, {pipeline_mode = #tpu.pipeline_mode<synchronous>, transform_indices = @transform_2, window_bounds = array<i64: 8, 4>}, {pipeline_mode = #tpu.pipeline_mode<synchronous>, transform_indices = @transform_3, window_bounds = array<i64: 8, 1>}, {transform_indices = @transform_4, window_bounds = array<i64: 1, 8, 288>}]} {
    %c0 = arith.constant 0 : index
    %c0_0 = arith.constant 0 : index
    %c0_1 = arith.constant 0 : index
    %0 = vector.load %arg1[%c0, %c0_0, %c0_1] : memref<1x4x326xf32, #tpu.memory_space<vmem>>, vector<1x4x326xf32>
    %1 = vector.shape_cast %0 : vector<1x4x326xf32> to vector<4x326xf32>
    %2 = vector.extract_strided_slice %1 {offsets = [0, 0], sizes = [4, 288], strides = [1, 1]} : vector<4x326xf32> to vector<4x288xf32>
    %c0_2 = arith.constant 0 : index
    %c0_3 = arith.constant 0 : index
    %c0_4 = arith.constant 0 : index
    %3 = vector.load %arg2[%c0_2, %c0_3, %c0_4] : memref<9x4x1xf32, #tpu.memory_space<vmem>>, vector<1x4x1xf32>
    %4 = vector.shape_cast %3 : vector<1x4x1xf32> to vector<4x1xf32>
    %5 = vector.broadcast %4 : vector<4x1xf32> to vector<4x288xf32>
    %6 = arith.mulf %2, %5 : vector<4x288xf32>
    %7 = vector.extract_strided_slice %1 {offsets = [0, 1], sizes = [4, 288], strides = [1, 1]} : vector<4x326xf32> to vector<4x288xf32>
    %c1 = arith.constant 1 : index
    %c0_5 = arith.constant 0 : index
    %c0_6 = arith.constant 0 : index
    %8 = vector.load %arg2[%c1, %c0_5, %c0_6] : memref<9x4x1xf32, #tpu.memory_space<vmem>>, vector<1x4x1xf32>
    %9 = vector.shape_cast %8 : vector<1x4x1xf32> to vector<4x1xf32>
    %10 = vector.broadcast %9 : vector<4x1xf32> to vector<4x288xf32>
    %11 = arith.mulf %7, %10 : vector<4x288xf32>
    %12 = arith.addf %6, %11 : vector<4x288xf32>
    %13 = vector.extract_strided_slice %1 {offsets = [0, 2], sizes = [4, 288], strides = [1, 1]} : vector<4x326xf32> to vector<4x288xf32>
    %c2 = arith.constant 2 : index
    %c0_7 = arith.constant 0 : index
    %c0_8 = arith.constant 0 : index
    %14 = vector.load %arg2[%c2, %c0_7, %c0_8] : memref<9x4x1xf32, #tpu.memory_space<vmem>>, vector<1x4x1xf32>
    %15 = vector.shape_cast %14 : vector<1x4x1xf32> to vector<4x1xf32>
    %16 = vector.broadcast %15 : vector<4x1xf32> to vector<4x288xf32>
    %17 = arith.mulf %13, %16 : vector<4x288xf32>
    %18 = arith.addf %12, %17 : vector<4x288xf32>
    %19 = vector.extract_strided_slice %1 {offsets = [0, 18], sizes = [4, 288], strides = [1, 1]} : vector<4x326xf32> to vector<4x288xf32>
    %c3 = arith.constant 3 : index
    %c0_9 = arith.constant 0 : index
    %c0_10 = arith.constant 0 : index
    %20 = vector.load %arg2[%c3, %c0_9, %c0_10] : memref<9x4x1xf32, #tpu.memory_space<vmem>>, vector<1x4x1xf32>
    %21 = vector.shape_cast %20 : vector<1x4x1xf32> to vector<4x1xf32>
    %22 = vector.broadcast %21 : vector<4x1xf32> to vector<4x288xf32>
    %23 = arith.mulf %19, %22 : vector<4x288xf32>
    %24 = arith.addf %18, %23 : vector<4x288xf32>
    %25 = vector.extract_strided_slice %1 {offsets = [0, 19], sizes = [4, 288], strides = [1, 1]} : vector<4x326xf32> to vector<4x288xf32>
    %c4 = arith.constant 4 : index
    %c0_11 = arith.constant 0 : index
    %c0_12 = arith.constant 0 : index
    %26 = vector.load %arg2[%c4, %c0_11, %c0_12] : memref<9x4x1xf32, #tpu.memory_space<vmem>>, vector<1x4x1xf32>
    %27 = vector.shape_cast %26 : vector<1x4x1xf32> to vector<4x1xf32>
    %28 = vector.broadcast %27 : vector<4x1xf32> to vector<4x288xf32>
    %29 = arith.mulf %25, %28 : vector<4x288xf32>
    %30 = arith.addf %24, %29 : vector<4x288xf32>
    %31 = vector.extract_strided_slice %1 {offsets = [0, 20], sizes = [4, 288], strides = [1, 1]} : vector<4x326xf32> to vector<4x288xf32>
    %c5 = arith.constant 5 : index
    %c0_13 = arith.constant 0 : index
    %c0_14 = arith.constant 0 : index
    %32 = vector.load %arg2[%c5, %c0_13, %c0_14] : memref<9x4x1xf32, #tpu.memory_space<vmem>>, vector<1x4x1xf32>
    %33 = vector.shape_cast %32 : vector<1x4x1xf32> to vector<4x1xf32>
    %34 = vector.broadcast %33 : vector<4x1xf32> to vector<4x288xf32>
    %35 = arith.mulf %31, %34 : vector<4x288xf32>
    %36 = arith.addf %30, %35 : vector<4x288xf32>
    %37 = vector.extract_strided_slice %1 {offsets = [0, 36], sizes = [4, 288], strides = [1, 1]} : vector<4x326xf32> to vector<4x288xf32>
    %c6 = arith.constant 6 : index
    %c0_15 = arith.constant 0 : index
    %c0_16 = arith.constant 0 : index
    %38 = vector.load %arg2[%c6, %c0_15, %c0_16] : memref<9x4x1xf32, #tpu.memory_space<vmem>>, vector<1x4x1xf32>
    %39 = vector.shape_cast %38 : vector<1x4x1xf32> to vector<4x1xf32>
    %40 = vector.broadcast %39 : vector<4x1xf32> to vector<4x288xf32>
    %41 = arith.mulf %37, %40 : vector<4x288xf32>
    %42 = arith.addf %36, %41 : vector<4x288xf32>
    %43 = vector.extract_strided_slice %1 {offsets = [0, 37], sizes = [4, 288], strides = [1, 1]} : vector<4x326xf32> to vector<4x288xf32>
    %c7 = arith.constant 7 : index
    %c0_17 = arith.constant 0 : index
    %c0_18 = arith.constant 0 : index
    %44 = vector.load %arg2[%c7, %c0_17, %c0_18] : memref<9x4x1xf32, #tpu.memory_space<vmem>>, vector<1x4x1xf32>
    %45 = vector.shape_cast %44 : vector<1x4x1xf32> to vector<4x1xf32>
    %46 = vector.broadcast %45 : vector<4x1xf32> to vector<4x288xf32>
    %47 = arith.mulf %43, %46 : vector<4x288xf32>
    %48 = arith.addf %42, %47 : vector<4x288xf32>
    %49 = vector.extract_strided_slice %1 {offsets = [0, 38], sizes = [4, 288], strides = [1, 1]} : vector<4x326xf32> to vector<4x288xf32>
    %c8 = arith.constant 8 : index
    %c0_19 = arith.constant 0 : index
    %c0_20 = arith.constant 0 : index
    %50 = vector.load %arg2[%c8, %c0_19, %c0_20] : memref<9x4x1xf32, #tpu.memory_space<vmem>>, vector<1x4x1xf32>
    %51 = vector.shape_cast %50 : vector<1x4x1xf32> to vector<4x1xf32>
    %52 = vector.broadcast %51 : vector<4x1xf32> to vector<4x288xf32>
    %53 = arith.mulf %49, %52 : vector<4x288xf32>
    %54 = arith.addf %48, %53 : vector<4x288xf32>
    %c0_21 = arith.constant 0 : index
    %c0_22 = arith.constant 0 : index
    %55 = vector.load %arg3[%c0_21, %c0_22] : memref<8x4xf32, #tpu.memory_space<vmem>>, vector<8x4xf32>
    %cst = arith.constant dense<0.000000e+00> : vector<8x288xf32>
    %56 = tpu.matmul %55, %54, %cst {dimension_numbers = #tpu.dot_dimension_numbers<[1], [0], [0], [1], [0, 0, 1, 1], [], []>} : vector<8x4xf32>, vector<4x288xf32>, vector<8x288xf32> -> vector<8x288xf32>
    %c0_23 = arith.constant 0 : index
    %c0_24 = arith.constant 0 : index
    %57 = vector.load %arg4[%c0_23, %c0_24] : memref<8x1xf32, #tpu.memory_space<vmem>>, vector<8x1xf32>
    %58 = vector.broadcast %57 : vector<8x1xf32> to vector<8x288xf32>
    %59 = arith.addf %56, %58 : vector<8x288xf32>
    %c0_25 = arith.constant 0 : index
    %c0_26 = arith.constant 0 : index
    %c0_27 = arith.constant 0 : index
    %60 = vector.load %arg5[%c0_25, %c0_26, %c0_27] : memref<1x8x288xf32, #tpu.memory_space<vmem>>, vector<1x8x288xf32>
    %61 = vector.shape_cast %60 : vector<1x8x288xf32> to vector<8x288xf32>
    %62 = vector.shape_cast %59 : vector<8x288xf32> to vector<1x8x288xf32>
    tpu.vector_store %arg5[%c0_25, %c0_26, %c0_27], %62 {strides = array<i32>} : memref<1x8x288xf32, #tpu.memory_space<vmem>>, vector<1x8x288xf32>,
    return
  }
  func.func @transform_0(%arg0: i32) -> (i32, i32, i32) {
    %c0_i32 = arith.constant 0 : i32
    %c0_i32_0 = arith.constant 0 : i32
    %c0_i32_1 = arith.constant 0 : i32
    return %arg0, %c0_i32, %c0_i32_0 : i32, i32, i32
  }
  func.func @transform_1(%arg0: i32) -> (i32, i32, i32) {
    %c0_i32 = arith.constant 0 : i32
    %c0_i32_0 = arith.constant 0 : i32
    %c0_i32_1 = arith.constant 0 : i32
    %c0_i32_2 = arith.constant 0 : i32
    return %c0_i32, %c0_i32_0, %c0_i32_1 : i32, i32, i32
  }
  func.func @transform_2(%arg0: i32) -> (i32, i32) {
    %c0_i32 = arith.constant 0 : i32
    %c0_i32_0 = arith.constant 0 : i32
    %c0_i32_1 = arith.constant 0 : i32
    return %c0_i32, %c0_i32_0 : i32, i32
  }
  func.func @transform_3(%arg0: i32) -> (i32, i32) {
    %c0_i32 = arith.constant 0 : i32
    %c0_i32_0 = arith.constant 0 : i32
    %c0_i32_1 = arith.constant 0 : i32
    return %c0_i32, %c0_i32_0 : i32, i32
  }
  func.func @transform_4(%arg0: i32) -> (i32, i32, i32) {
    %c0_i32 = arith.constant 0 : i32
    %c0_i32_0 = arith.constant 0 : i32
    %c0_i32_1 = arith.constant 0 : i32
    return %arg0, %c0_i32, %c0_i32_0 : i32, i32, i32
  }
}

</mosaic_0001>

<bundles_post_ra>
// kernel: tpu_custom_call.1
= control target key start
LH: loop header
LB: loop body
LE: loop exit
PB: predicated region body
PF: predicated region fallthrough
CT: control target
= control target key end

     0   :  { %9 = vsyncpa [#allocation3], 0  ;;  %s1016_s0 = inlined_call_operand.vmem [shape: f32[2,4,326], index: 0, kind: input, shape index: {}]   ;;  %s1017_s1 = inlined_call_operand.vmem [shape: f32[9,4,1], index: 1, kind: input, shape index: {}]   ;;  %s1018_s2 = inlined_call_operand.vmem [shape: f32[8,4], index: 2, kind: input, shape index: {}]   ;;  %s1019_s3 = inlined_call_operand.vmem [shape: f32[8,1], index: 3, kind: input, shape index: {}]   ;;  %s1020_s4 = inlined_call_operand.hbm [shape: f32[2,8,288], index: 4, kind: output, shape index: {}]  }
   0x1   :  { %11 = vsyncpa [#allocation3 + $0x1], 0  ;;  %s885_s15 = smov 0   ;;  %s887_s16 = smov 0  }
   0x2   :  { %s889_s17 = smov 0   ;;  %s891_s18 = smov 0  }
   0x3 LB: > { %s906_s19 = sadd.s32 4294967295, %s845_s18   ;;  %s701_s20 = sadd.s32 4294967294, %s845_s18   ;;  %s845_s18 = sphi %s891_s18, %s1026_s18   ;;  %s841_s17 = sphi %s889_s17, %s1025_s17   ;;  %s837_s16 = sphi %s887_s16, %s1024_s16   ;;  %s833_s15 = sphi %s885_s15, %s1023_s15  }
   0x4   : > { %s910_s21 = sadd.s32 1, %s845_s18   ;;  %s113_s22 = sadd.s32 1, %s841_s17 }
   0x5   : > { %s110_s23 = ssub.s32 %s845_s18, %s910_s21  ;;  %p123_p0 = scmp.ne.s32.totalorder %s841_s17, %s837_s16 }
   0x6   : > { %p111_p1 = scmp.eq.s32.totalorder %s110_s23, 0  ;;  %p124_p2 = scmp.eq.s32.totalorder %s906_s19, 1 }
   0x7   : > { %p129_p3 = scmp.ne.s32.totalorder %s837_s16, %s833_s15  ;;  %p130_p4 = scmp.eq.s32.totalorder %s701_s20, 1 }
   0x8   : > { %s921_s24 = scalar_select %p111_p1, %s841_s17, %s113_s22  }
   0x9   : > { %p923_p5 = por %p124_p2, %p123_p0  ;;  %p927_p6 = por %p130_p4, %p129_p3 }
   0xa   : > { %p704_p7 = scmp.ge.s32.totalorder %s845_s18, 1  ;;  %p165_p8 = scmp.lt.s32.totalorder %s845_s18, 3 }
   0xc   : > { %p166_p9 = pnand %p704_p7, %p165_p8 }
   0xd   : > { %p191_p10 = scmp.lt.s32.totalorder (!%p166_p9), %s906_s19, 1  ;;  %s849_s7 = smov (!%p166_p9), 127  }
   0xe   : > { %169 = sbr.rel (%p166_p9) target bundleno = 512 (0x200), region = 36  ;;  %s850_s8 = smov (!%p166_p9), 126  }
   0xf   : > { %s851_s9 = smov (!%p166_p9), 110   ;;  %s852_s10 = smov (!%p166_p9), 109  }
  0x10   : > { %s853_s11 = smov (!%p166_p9), 108   ;;  %s856_s12 = smov (!%p166_p9), 92  }
  0x11   : > { %s857_s13 = smov (!%p166_p9), 91   ;;  %s858_s14 = smov (!%p166_p9), 90  }
  0x12   : > { %s731_s5 = smul.u32 (!%p166_p9), 384, %s906_s19 }
  0x13   : > { %v708_v0 = vld [vmem:[%s1017_s1 + $0xc] sm:$0xf]  ;;  %v706_v1 = vld [vmem:[%s1017_s1 + $0x4] sm:$0xf]  ;;  %v847_v2 = vmov 0   ;;  %v206_v12 = vlaneseq  ;;  %s192_s28 = scalar_select %p191_p10, %s906_s19, 1 }
  0x14   : > { %784 = vset.pattern.permute.xlu1 %v847_v2  ;;  %783 = vset.pattern.permute.xlu0 %v847_v2  ;;  %v709_v3 = vld [vmem:[%s1017_s1 + $0x10] sm:$0xf]  ;;  %v707_v4 = vld [vmem:[%s1017_s1 + $0x8] sm:$0xf]  ;;  %v711_v5 = vld [vmem:[%s1017_s1 + $0x18] sm:$0xf] }
  0x15   : > { %280 = vperm.xlu1 %784, %v708_v0   ;;  %217 = vperm.xlu0 %783, %v706_v1   ;;  %v710_v6 = vld [vmem:[%s1017_s1 + $0x14] sm:$0xf]  ;;  %v713_v7 = vld [vmem:[%s1017_s1 + $0x20] sm:$0xf]  ;;  %v712_v8 = vld [vmem:[%s1017_s1 + $0x1c] sm:$0xf] }
  0x16   : > { %v198_v9 = vld [vmem:[%s1017_s1] sm:$0xf]  ;;  %v848_v10 = vmov 839922192   ;;  %v207_v14 = vshrl.u32 %v206_v12, 7  ;;  %s730_s29 = smul.u32 12, %s192_s28 }
  0x17   : > { %v204_v11 = vunpack.c.l.s4 %v848_v10  ;;  %v854_v45 = vmov 0.0   ;;  %vm855_vm0 = vmmov 0   ;;  %v463_v55 = vld [vmem:[%s1019_s3] sm:$0xff]  ;;  %vm237_vm1 = vcmask 1043456   ;;  %s188_s28 = sand.u32 1, %s837_s16  }
  0x18   : > { %s195_s6 = scalar_lea.vmem %s1016_s0, %s730_s29  ;;  %724 = vmatprep.subr.mxu1 %v854_v45  ;;  %726 = vmatprep.mubr.msk.f32.mxu1 %vm855_vm0, %v854_v45  ;;  %vm239_vm2 = vcmask 1039360   ;;  %vm270_vm3 = vcmask 1031168   ;;  %vm301_vm4 = vcmask 900096   ;;  %vm332_vm5 = vcmask 891904   ;;  %s729_s29 = smul.u32 24, %s188_s28 }
  0x19   : > { %311 = vperm.xlu1 %784, %v709_v3   ;;  %249 = vperm.xlu0 %783, %v707_v4   ;;  %v205_v13 = vunpack.c.0.s8 %v204_v11  ;;  %v196_v16 = vld [vmem:[%s195_s6] sm:$0xff]  ;;  %v197_v17 = vld [vmem:[%s195_s6 + $0x8] sm:$0xf]  ;;  %vm363_vm6 = vcmask 883712   ;;  %vm394_vm7 = vcmask 752640   ;;  %vm425_vm8 = vcmask 744448  }
  0x1a   : > { %546 = vmatprep.mubr.f32.mxu0 %v854_v45  ;;  %vm456_vm9 = vcmask 736256   ;;  %vm472_vm10 = vcmask 31744   ;;  %vm625_vm11 = vcmask 261120   ;;  %s190_s30 = scalar_lea.vmem [#allocation2], %s729_s29 }
  0x1b   : > { %v208_v15 = vsub.s32 %v205_v13, %v207_v14  ;;  %s642_s6 = sshll.u32 %s190_s30, 4  ;;  %s643_s6 = int_to_ptr.vmem [resolvable:$true] %s642_s6 }
  0x1d   : > { %373 = vperm.xlu1 %784, %v711_v5   ;;  %342 = vperm.xlu0 %783, %v710_v6  }
  0x21   : > { %435 = vperm.xlu1 %784, %v713_v7   ;;  %404 = vperm.xlu0 %783, %v712_v8  }
  0x25   : > { %201 = vperm.xlu0 %783, %v198_v9  }
  0x90   : > { %v218_v18 = vpop.permute.xlu0 %217  ;;  %v281_v20 = vpop.permute.xlu1 %280 }
  0x91   : > { %v225_v19 = vrot.slane %v218_v18, %v208_v15  ;;  %v288_v24 = vrot.slane %v281_v20, %v208_v15 }
  0x93   : > { %v227_v21 = vmul.f32 %v225_v19, %v196_v16  ;;  %v228_v22 = vmul.f32 %v225_v19, %v197_v17  ;;  %v290_v29 = vmul.f32 %v288_v24, %v196_v16  ;;  %v291_v30 = vmul.f32 %v288_v24, %v197_v17 }
  0x94   : > { %v250_v23 = vpop.permute.xlu0 %249  ;;  %v312_v31 = vpop.permute.xlu1 %311 }
  0x95   : > { %v257_v25 = vrot.slane %v250_v23, %v208_v15  ;;  %233 = vrot.lane.b32.xlu0 %v228_v22, %s849_s7  ;;  %231 = vrot.lane.b32.xlu1 %v227_v21, %s849_s7  ;;  %v319_v32 = vrot.slane %v312_v31, %v208_v15 }
  0x97   : > { %v259_v26 = vmul.f32 %v257_v25, %v196_v16  ;;  %v260_v27 = vmul.f32 %v257_v25, %v197_v17  ;;  %v321_v34 = vmul.f32 %v319_v32, %v196_v16  ;;  %v322_v35 = vmul.f32 %v319_v32, %v197_v17 }
  0x98   : > { %v343_v28 = vpop.permute.xlu0 %342  ;;  %v374_v36 = vpop.permute.xlu1 %373 }
  0x99   : > { %265 = vrot.lane.b32.xlu0 %v260_v27, %s850_s8  ;;  %263 = vrot.lane.b32.xlu1 %v259_v26, %s850_s8  ;;  %v350_v37 = vrot.slane %v343_v28, %v208_v15  ;;  %v381_v40 = vrot.slane %v374_v36, %v208_v15 }
  0x9b   : > { %v352_v41 = vmul.f32 %v350_v37, %v196_v16  ;;  %v353_v42 = vmul.f32 %v350_v37, %v197_v17  ;;  %v383_v46 = vmul.f32 %v381_v40, %v196_v16  ;;  %v384_v47 = vmul.f32 %v381_v40, %v197_v17 }
  0x9c   : > { %v405_v33 = vpop.permute.xlu0 %404  ;;  %v436_v49 = vpop.permute.xlu1 %435 }
  0x9d   : > { %296 = vrot.lane.b32.xlu0 %v291_v30, %s851_s9  ;;  %294 = vrot.lane.b32.xlu1 %v290_v29, %s851_s9  ;;  %v412_v48 = vrot.slane %v405_v33, %v208_v15  ;;  %v443_v50 = vrot.slane %v436_v49, %v208_v15  ;;  %s640_s9 = scalar_lea.hbm %s1020_s4, %s731_s5 }
  0x9f   : > { %v414_v51 = vmul.f32 %v412_v48, %v196_v16  ;;  %v415_v52 = vmul.f32 %v412_v48, %v197_v17  ;;  %v445_v53 = vmul.f32 %v443_v50, %v196_v16  ;;  %v446_v54 = vmul.f32 %v443_v50, %v197_v17 }
  0xa0   : > { %v202_v38 = vpop.permute.xlu0 %201 }
  0xa1   : > { %v209_v39 = vrot.slane %v202_v38, %v208_v15  ;;  %327 = vrot.lane.b32.xlu0 %v322_v35, %s852_s10  ;;  %325 = vrot.lane.b32.xlu1 %v321_v34, %s852_s10  ;;  %s628_s10 = scalar_lea.sflag [#allocation3], %s188_s28 }
  0xa3   : > { %v211_v43 = vmul.f32 %v209_v39, %v196_v16  ;;  %v212_v44 = vmul.f32 %v209_v39, %v197_v17 }
  0xa5   : > { %358 = vrot.lane.b32.xlu0 %v353_v42, %s853_s11  ;;  %356 = vrot.lane.b32.xlu1 %v352_v41, %s853_s11  ;;  %s785_s11 = scalar_lea.vmem %s643_s6, 384 }
  0xa6   : > { %p786_p11 = scmp.ne.s32.totalorder %s643_s6, %s785_s11 }
  0xa8   : > { %p787_p12 = pnand %p786_p11, %p923_p5 }
  0xa9   : > { %389 = vrot.lane.b32.xlu0 %v384_v47, %s856_s12  ;;  %387 = vrot.lane.b32.xlu1 %v383_v46, %s856_s12  ;;  %s859_s12 = smov [#allocation2]  }
  0xaa   : > { %p788_p13 = pneg %p787_p12  ;;  %s789_s19 = sshll.u32 %s859_s12, 4  ;;  %s790_s19 = int_to_ptr.vmem [resolvable:$false] %s789_s19 }
  0xab   : > { %p792_p0 = scmp.lt.s32.totalorder %s643_s6, %s790_s19 }
  0xad   : > { %420 = vrot.lane.b32.xlu0 %v415_v52, %s857_s13  ;;  %418 = vrot.lane.b32.xlu1 %v414_v51, %s857_s13  ;;  %v462_v52 = vld [vmem:[%s1018_s2] sm:$0xff]  ;;  %s791_s13 = scalar_lea.vmem %s790_s19, 768 }
  0xae   : > { %p793_p1 = scmp.lt.s32.totalorder %s791_s13, %s785_s11 }
  0xb0   : > { %p794_p2 = por %p793_p1, %p792_p0 }
  0xb1   : > { %451 = vrot.lane.b32.xlu0 %v446_v54, %s858_s14  ;;  %449 = vrot.lane.b32.xlu1 %v445_v53, %s858_s14 }
  0xb2   : > { %p795_p3 = pnand %p794_p2, %p788_p13 }
  0xb5   : > { %466 = vperm.xlu1 %784, %v463_v55  }
 0x107   : > { %v234_v56 = vpop.permute.xlu0 %233  ;;  %v232_v57 = vpop.permute.xlu1 %231 }
 0x108   : > { %v236_v60 = vrot.slane %v234_v56, 4  ;;  %v235_v61 = vrot.slane %v232_v57, 4  ;;  %v244_v7 = vadd.f32 %v234_v56, %v212_v44 }
 0x10a   : > { %v238_v2 = vsel %vm237_vm1, %v235_v61, %v236_v60 }
 0x10b   : > { %v266_v58 = vpop.permute.xlu0 %265  ;;  %v264_v59 = vpop.permute.xlu1 %263  ;;  %v240_v9 = vsel %vm239_vm2, %v232_v57, %v238_v2 }
 0x10c   : > { %v268_v0 = vrot.slane %v266_v58, 4  ;;  %v267_v1 = vrot.slane %v264_v59, 4  ;;  %v275_v12 = vadd.f32 %v266_v58, %v244_v7  ;;  %v243_v19 = vadd.f32 %v240_v9, %v211_v43 }
 0x10e   : > { %v269_v8 = vsel %vm237_vm1, %v267_v1, %v268_v0 }
 0x10f   : > { %v297_v62 = vpop.permute.xlu0 %296  ;;  %v295_v63 = vpop.permute.xlu1 %294  ;;  %v271_v15 = vsel %vm270_vm3, %v264_v59, %v269_v8 }
 0x110   : > { %v299_v5 = vrot.slane %v297_v62, 4  ;;  %v298_v6 = vrot.slane %v295_v63, 4  ;;  %v306_v20 = vadd.f32 %v297_v62, %v275_v12  ;;  %v274_v22 = vadd.f32 %v271_v15, %v243_v19 }
 0x112   : > { %v300_v16 = vsel %vm237_vm1, %v298_v6, %v299_v5 }
 0x113   : > { %v328_v3 = vpop.permute.xlu0 %327  ;;  %v326_v4 = vpop.permute.xlu1 %325  ;;  %v302_v23 = vsel %vm301_vm4, %v295_v63, %v300_v16 }
 0x114   : > { %v330_v10 = vrot.slane %v328_v3, 4  ;;  %v329_v11 = vrot.slane %v326_v4, 4  ;;  %v337_v26 = vadd.f32 %v328_v3, %v306_v20  ;;  %v305_v31 = vadd.f32 %v302_v23, %v274_v22 }
 0x116   : > { %v331_v21 = vsel %vm237_vm1, %v329_v11, %v330_v10 }
 0x117   : > { %v359_v13 = vpop.permute.xlu0 %358  ;;  %v357_v14 = vpop.permute.xlu1 %356  ;;  %v333_v30 = vsel %vm332_vm5, %v326_v4, %v331_v21 }
 0x118   : > { %v361_v17 = vrot.slane %v359_v13, 4  ;;  %v360_v18 = vrot.slane %v357_v14, 4  ;;  %v368_v32 = vadd.f32 %v359_v13, %v337_v26  ;;  %v336_v37 = vadd.f32 %v333_v30, %v305_v31 }
 0x11a   : > { %v362_v27 = vsel %vm237_vm1, %v360_v18, %v361_v17 }
 0x11b   : > { %v390_v24 = vpop.permute.xlu0 %389  ;;  %v388_v25 = vpop.permute.xlu1 %387  ;;  %v364_v34 = vsel %vm363_vm6, %v357_v14, %v362_v27 }
 0x11c   : > { %v392_v28 = vrot.slane %v390_v24, 4  ;;  %v391_v29 = vrot.slane %v388_v25, 4  ;;  %v399_v38 = vadd.f32 %v390_v24, %v368_v32  ;;  %v367_v42 = vadd.f32 %v364_v34, %v336_v37 }
 0x11e   : > { %v393_v33 = vsel %vm237_vm1, %v391_v29, %v392_v28 }
 0x11f   : > { %v421_v35 = vpop.permute.xlu0 %420  ;;  %v419_v36 = vpop.permute.xlu1 %418  ;;  %v395_v41 = vsel %vm394_vm7, %v388_v25, %v393_v33 }
 0x120   : > { %v423_v39 = vrot.slane %v421_v35, 4  ;;  %v422_v40 = vrot.slane %v419_v36, 4  ;;  %v430_v43 = vadd.f32 %v421_v35, %v399_v38  ;;  %v398_v48 = vadd.f32 %v395_v41, %v367_v42 }
 0x122   : > { %v424_v44 = vsel %vm237_vm1, %v422_v40, %v423_v39 }
 0x123   : > { %v426_v45 = vsel %vm425_vm8, %v419_v36, %v424_v44  ;;  %v452_v46 = vpop.permute.xlu0 %451  ;;  %v450_v47 = vpop.permute.xlu1 %449 }
 0x124   : > { %v454_v49 = vrot.slane %v452_v46, 4  ;;  %v461_v50 = vadd.f32 %v452_v46, %v430_v43  ;;  %v453_v51 = vrot.slane %v450_v47, 4  ;;  %v429_v53 = vadd.f32 %v426_v45, %v398_v48 }
 0x126   : > { %v455_v54 = vsel %vm237_vm1, %v453_v51, %v454_v49  ;;  %725 = vmatpush3.msk.msra.mxu1 %vm237_vm1, %v461_v50 }
 0x127   : > { %v457_v55 = vsel %vm456_vm9, %v450_v47, %v455_v54  ;;  %727 = vmatmul.mubr.msk.f32.vlgmr.msra.gmra.mxu1 %vm472_vm10, %v462_v52 }
 0x128   : > { %v460_v56 = vadd.f32 %v457_v55, %v429_v53 }
 0x12a   : > { %v471_v57 = vcombine.high %v460_v56, %v460_v56 }
 0x12c   : > { %714 = vmatprep.subr.msk.mxu0 %vm237_vm1, %v471_v57 }
 0x12d   : > { %715 = vmatpush1.msk.msra.mxu0 %vm237_vm1, %v460_v56 }
 0x12e   : > { %716 = vmatmul.mubr.msk.f32.vlgmr.msra.gmra.mxu0 %vm472_vm10, %v462_v52 }
 0x130   : > { %v467_v58 = vpop.permute.xlu1 %466 }
 0x1e7   : > { %v619_v59 = vpop.f32.mrf.mxu1 }
 0x1e8   : > { %v620_v60 = vadd.f32 %v619_v59, %v467_v58 }
 0x1e9   : > { %v728_v61 = vpop.f32.mrf.mxu1 }
 0x1ea   : > { %626 = vst.msk [vmem:[%s190_s30 + $0x10] sm:$0xff] %vm625_vm11, %v620_v60 }
 0x1ee   : > { %v548_v62 = vpop.f32.mrf.mxu0 }
 0x1ef   : > { %v549_v63 = vadd.f32 %v548_v62, %v467_v58 }
 0x1f0   : > { %v550_v0 = vpop.f32.mrf.mxu0 }
 0x1f1   : > { %623 = vst [vmem:[%s190_s30] sm:$0xff] %v549_v63  ;;  %v551_v1 = vadd.f32 %v550_v0, %v467_v58 }
 0x1f3   : > { %624 = vst [vmem:[%s190_s30 + $0x8] sm:$0xff] %v551_v1 }
 0x1f4   : > { %798 = shalt.err (!%p795_p3)
}
 0x1f5   : > { %s799_s14 = scalar_lea.hbm %s640_s9, 384  ;;  %s803_s23 = scalar_lea.hbm %s1020_s4, 768 }
 0x1f6   : > { %p800_p4 = scmp.ne.s32.totalorder %s640_s9, %s799_s14  ;;  %p804_p9 = scmp.lt.s32.totalorder %s640_s9, %s1020_s4 }
 0x1f7   : > { %p805_p10 = scmp.lt.s32.totalorder %s803_s23, %s799_s14 }
 0x1f8   : > { %p801_p7 = pnand %p800_p4, %p923_p5 }
 0x1f9   : > { %p806_p11 = por %p805_p10, %p804_p9 }
 0x1fa   : > { %p802_p8 = pneg %p801_p7 }
 0x1fc   : > { %p807_p12 = pnand %p806_p11, %p802_p8 }
 0x1fe   : > { %810 = shalt.err (!%p807_p12)
}
 0x1ff   : > { %732 = dma.vmem_to_hbm [thread:$0]  (%p923_p5), %s643_s6, 384, %s640_s9, %s628_s10  }
 0x200 PF: > { %p738_p13 = scmp.ge.s32.totalorder %s845_s18, 2  ;;  %s654_s29 = sand.u32 1, %s833_s15  }
 0x201   : > { %s655_s30 = scalar_lea.sflag [#allocation3], %s654_s29 }
 0x202   : > { %p735_p0 = pnand %p738_p13, %p927_p6 }
 0x204   : > { %p736_p1 = pneg %p735_p0 }
 0x206   : > { %828 = dma.done.wait (%p736_p1), %s655_s30, 384  }
 0x207   : > { %830 = vsyncadd (%p736_p1), %s655_s30, 4294966912  ;;  %p14_p2 = scmp.ge.s32.totalorder %s910_s21, 4   ;;  %s1023_s15 = smov %s837_s16 }
 0x208   : > { %s1024_s16 = smov %s841_s17  ;;  %s1025_s17 = smov %s921_s24 }
 0x209   : > { %s1026_s18 = smov %s910_s21  ;;  %16 = sbr.rel (!%p14_p2) target bundleno = 3 (0x3), region = 79 }
 0x20e   :  { %660 = vsyncpa [#allocation3], 1 }
 0x20f   :  { %662 = vsyncpa [#allocation3 + $0x1], 1 }

</bundles_post_ra>
